<compile_context>
chip_gen: v6e
topology: v6e:2x2x1
jax: 0.10.0
libtpu: 0.0.40
codegen_flags: <defaults>
</compile_context>

<pallas_src>
import jax
import jax.numpy as jnp
from jax.experimental import pallas as pl
from jax.experimental.pallas import tpu as pltpu


def _round_up(x, m):
    return ((x + m - 1) // m) * m


def mlp_kernel(x_ref, w1_ref, b1_ref, w2_ref, b2_ref, w3_ref, b3_ref, o_ref):
    # One batch tile: all three matmuls on the MXU with f32 accumulation;
    # bias adds / ReLU on the VPU in f32; re-cast to bf16 only for MXU inputs.
    x = x_ref[...]
    h1 = jnp.dot(x, w1_ref[...], preferred_element_type=jnp.float32)
    h1 = jnp.maximum(h1 + b1_ref[...], 0.0)
    h2 = jnp.dot(h1.astype(w2_ref.dtype), w2_ref[...],
                 preferred_element_type=jnp.float32)
    h2 = jnp.maximum(h2 + b2_ref[...], 0.0)
    out = jnp.dot(h2.astype(w3_ref.dtype), w3_ref[...],
                  preferred_element_type=jnp.float32)
    o_ref[...] = (out + b3_ref[...]).astype(o_ref.dtype)


def neural_net_forward(x, params, *, batch_tile=256, compute_dtype=jnp.bfloat16):
    """3-layer MLP forward as a single fused Pallas kernel, tiled over batch."""
    w1, b1, w2, b2, w3, b3 = params
    B, in_dim = x.shape
    hid = w1.shape[1]
    ncls = w3.shape[1]

    assert batch_tile % 128 == 0, "batch_tile must be a multiple of 128 (MXU/sublane aligned)"

    # Lane-dense feature dims (multiples of 128) and MXU-aligned batch.
    in_p = _round_up(in_dim, 128)
    hid_p = _round_up(hid, 128)
    ncls_p = _round_up(ncls, 128)
    B_p = _round_up(B, batch_tile)
    grid = (B_p // batch_tile,)

    def pad2(a, rows, cols):
        return jnp.pad(a, ((0, rows - a.shape[0]), (0, cols - a.shape[1])))

    # Zero-padding is exact: padded x cols / weight rows-cols / bias cols all
    # contribute 0 through the ReLU chain; padded outputs are sliced off.
    xp = pad2(x, B_p, in_p).astype(compute_dtype)
    w1p = pad2(w1, in_p, hid_p).astype(compute_dtype)
    w2p = pad2(w2, hid_p, hid_p).astype(compute_dtype)
    w3p = pad2(w3, hid_p, ncls_p).astype(compute_dtype)
    b1p = pad2(b1, 1, hid_p).astype(jnp.float32)
    b2p = pad2(b2, 1, hid_p).astype(jnp.float32)
    b3p = pad2(b3, 1, ncls_p).astype(jnp.float32)

    bpe = jnp.dtype(compute_dtype).itemsize
    weight_bytes = (in_p * hid_p + hid_p * hid_p + hid_p * ncls_p) * bpe
    io_bytes = 2 * (batch_tile * in_p * bpe) + 2 * (batch_tile * ncls_p * 4)
    act_bytes = 2 * batch_tile * hid_p * 4 + batch_tile * ncls_p * 4
    vmem_need = 2 * weight_bytes + io_bytes + act_bytes + (1 << 20)
    vmem_limit = int(min(max(vmem_need, 8 << 20), 64 << 20))

    flops = 2 * B_p * (in_p * hid_p + hid_p * hid_p + hid_p * ncls_p)
    bytes_accessed = (
        B_p * in_p * bpe
        + weight_bytes
        + (hid_p + hid_p + ncls_p) * 4
        + B_p * ncls_p * 4
    )
    cost = pl.CostEstimate(flops=int(flops), transcendentals=0,
                           bytes_accessed=int(bytes_accessed))

    out = pl.pallas_call(
        mlp_kernel,
        out_shape=jax.ShapeDtypeStruct((B_p, ncls_p), jnp.float32),
        grid_spec=pltpu.PrefetchScalarGridSpec(
            num_scalar_prefetch=0,
            grid=grid,
            in_specs=[
                pl.BlockSpec((batch_tile, in_p), lambda i: (i, 0)),  # x tile
                pl.BlockSpec((in_p, hid_p), lambda i: (0, 0)),       # w1 (resident)
                pl.BlockSpec((1, hid_p), lambda i: (0, 0)),          # b1
                pl.BlockSpec((hid_p, hid_p), lambda i: (0, 0)),      # w2 (resident)
                pl.BlockSpec((1, hid_p), lambda i: (0, 0)),          # b2
                pl.BlockSpec((hid_p, ncls_p), lambda i: (0, 0)),     # w3 (resident)
                pl.BlockSpec((1, ncls_p), lambda i: (0, 0)),         # b3
            ],
            out_specs=pl.BlockSpec((batch_tile, ncls_p), lambda i: (i, 0)),
        ),
        compiler_params=pltpu.CompilerParams(
            dimension_semantics=("parallel",),
            vmem_limit_bytes=vmem_limit,
        ),
        cost_estimate=cost,
    )(xp, w1p, b1p, w2p, b2p, w3p, b3p)

    return out[:B, :ncls]


def init_params(key, input_size, hidden_size, num_classes):
    """Deterministic init matching nn.Linear (U(+-1/sqrt(fan_in)), W stored as W.T)."""
    ks = jax.random.split(key, 6)

    def lin(kw, kb, fan_in, fan_out):
        bound = 1.0 / jnp.sqrt(fan_in)
        w = jax.random.uniform(kw, (fan_in, fan_out), jnp.float32, -bound, bound)
        b = jax.random.uniform(kb, (1, fan_out), jnp.float32, -bound, bound)
        return w, b

    w1, b1 = lin(ks[0], ks[1], input_size, hidden_size)
    w2, b2 = lin(ks[2], ks[3], hidden_size, hidden_size)
    w3, b3 = lin(ks[4], ks[5], hidden_size, num_classes)
    return (w1, b1, w2, b2, w3, b3)


def reference_forward(x, params, compute_dtype=jnp.bfloat16):
    """Pure-JAX reference mirroring the kernel's dtype plan (bf16 MXU, f32 accum)."""
    w1, b1, w2, b2, w3, b3 = params
    cd = compute_dtype
    h = jnp.dot(x.astype(cd), w1.astype(cd), preferred_element_type=jnp.float32)
    h = jnp.maximum(h + b1, 0.0)
    h = jnp.dot(h.astype(cd), w2.astype(cd), preferred_element_type=jnp.float32)
    h = jnp.maximum(h + b2, 0.0)
    out = jnp.dot(h.astype(cd), w3.astype(cd), preferred_element_type=jnp.float32)
    return out + b3


if __name__ == "__main__":
    input_size, hidden_size, num_classes = 32, 32, 16
    batch = 512  # -> padded grid of 2 x 256-row tiles (pipelined, megacore-shardable)

    key = jax.random.PRNGKey(0)
    kx, kp = jax.random.split(key)
    x = jax.random.normal(kx, (batch, input_size), jnp.float32)
    params = init_params(kp, input_size, hidden_size, num_classes)

    out = neural_net_forward(x, params)
    out = jax.block_until_ready(out)

    ref = reference_forward(x, params)
    assert out.shape == (batch, num_classes)
    assert jnp.allclose(out, ref, atol=1e-4, rtol=1e-4), float(jnp.max(jnp.abs(out - ref)))

    print("KERNEL_OK")
</pallas_src>

<mosaic_0001>
module attributes {stable_mosaic.version = 11 : i64} {
  func.func @mlp_kernel(%arg0: i32, %arg1: memref<256x128xbf16, #tpu.memory_space<vmem>>, %arg2: memref<128x128xbf16, #tpu.memory_space<vmem>>, %arg3: memref<1x128xf32, #tpu.memory_space<vmem>>, %arg4: memref<128x128xbf16, #tpu.memory_space<vmem>>, %arg5: memref<1x128xf32, #tpu.memory_space<vmem>>, %arg6: memref<128x128xbf16, #tpu.memory_space<vmem>>, %arg7: memref<1x128xf32, #tpu.memory_space<vmem>>, %arg8: memref<256x128xf32, #tpu.memory_space<vmem>>) attributes {dimension_semantics = [#tpu.dimension_semantics<parallel>], iteration_bounds = array<i64: 2>, scalar_prefetch = 0 : i64, scratch_operands = 0 : i64, tpu.core_type = #tpu.core_type<tc>, window_params = [{transform_indices = @transform_0, window_bounds = array<i64: 256, 128>}, {pipeline_mode = #tpu.pipeline_mode<synchronous>, transform_indices = @transform_1, window_bounds = array<i64: 128, 128>}, {pipeline_mode = #tpu.pipeline_mode<synchronous>, transform_indices = @transform_2, window_bounds = array<i64: 1, 128>}, {pipeline_mode = #tpu.pipeline_mode<synchronous>, transform_indices = @transform_3, window_bounds = array<i64: 128, 128>}, {pipeline_mode = #tpu.pipeline_mode<synchronous>, transform_indices = @transform_4, window_bounds = array<i64: 1, 128>}, {pipeline_mode = #tpu.pipeline_mode<synchronous>, transform_indices = @transform_5, window_bounds = array<i64: 128, 128>}, {pipeline_mode = #tpu.pipeline_mode<synchronous>, transform_indices = @transform_6, window_bounds = array<i64: 1, 128>}, {transform_indices = @transform_7, window_bounds = array<i64: 256, 128>}]} {
    %c0 = arith.constant 0 : index
    %c0_0 = arith.constant 0 : index
    %0 = vector.load %arg1[%c0, %c0_0] : memref<256x128xbf16, #tpu.memory_space<vmem>>, vector<256x128xbf16>
    %c0_1 = arith.constant 0 : index
    %c0_2 = arith.constant 0 : index
    %1 = vector.load %arg2[%c0_1, %c0_2] : memref<128x128xbf16, #tpu.memory_space<vmem>>, vector<128x128xbf16>
    %cst = arith.constant dense<0.000000e+00> : vector<256x128xf32>
    %2 = tpu.matmul %0, %1, %cst {dimension_numbers = #tpu.dot_dimension_numbers<[1], [0], [0], [1], [0, 0, 1, 1], [], []>} : vector<256x128xbf16>, vector<128x128xbf16>, vector<256x128xf32> -> vector<256x128xf32>
    %c0_3 = arith.constant 0 : index
    %c0_4 = arith.constant 0 : index
    %3 = vector.load %arg3[%c0_3, %c0_4] : memref<1x128xf32, #tpu.memory_space<vmem>>, vector<1x128xf32>
    %4 = vector.broadcast %3 : vector<1x128xf32> to vector<256x128xf32>
    %5 = arith.addf %2, %4 : vector<256x128xf32>
    %cst_5 = arith.constant 0.000000e+00 : f32
    %6 = vector.broadcast %cst_5 : f32 to vector<256x128xf32>
    %7 = arith.maximumf %5, %6 : vector<256x128xf32>
    %8 = arith.truncf %7 : vector<256x128xf32> to vector<256x128xbf16>
    %c0_6 = arith.constant 0 : index
    %c0_7 = arith.constant 0 : index
    %9 = vector.load %arg4[%c0_6, %c0_7] : memref<128x128xbf16, #tpu.memory_space<vmem>>, vector<128x128xbf16>
    %cst_8 = arith.constant dense<0.000000e+00> : vector<256x128xf32>
    %10 = tpu.matmul %8, %9, %cst_8 {dimension_numbers = #tpu.dot_dimension_numbers<[1], [0], [0], [1], [0, 0, 1, 1], [], []>} : vector<256x128xbf16>, vector<128x128xbf16>, vector<256x128xf32> -> vector<256x128xf32>
    %c0_9 = arith.constant 0 : index
    %c0_10 = arith.constant 0 : index
    %11 = vector.load %arg5[%c0_9, %c0_10] : memref<1x128xf32, #tpu.memory_space<vmem>>, vector<1x128xf32>
    %12 = vector.broadcast %11 : vector<1x128xf32> to vector<256x128xf32>
    %13 = arith.addf %10, %12 : vector<256x128xf32>
    %cst_11 = arith.constant 0.000000e+00 : f32
    %14 = vector.broadcast %cst_11 : f32 to vector<256x128xf32>
    %15 = arith.maximumf %13, %14 : vector<256x128xf32>
    %16 = arith.truncf %15 : vector<256x128xf32> to vector<256x128xbf16>
    %c0_12 = arith.constant 0 : index
    %c0_13 = arith.constant 0 : index
    %17 = vector.load %arg6[%c0_12, %c0_13] : memref<128x128xbf16, #tpu.memory_space<vmem>>, vector<128x128xbf16>
    %cst_14 = arith.constant dense<0.000000e+00> : vector<256x128xf32>
    %18 = tpu.matmul %16, %17, %cst_14 {dimension_numbers = #tpu.dot_dimension_numbers<[1], [0], [0], [1], [0, 0, 1, 1], [], []>} : vector<256x128xbf16>, vector<128x128xbf16>, vector<256x128xf32> -> vector<256x128xf32>
    %c0_15 = arith.constant 0 : index
    %c0_16 = arith.constant 0 : index
    %19 = vector.load %arg7[%c0_15, %c0_16] : memref<1x128xf32, #tpu.memory_space<vmem>>, vector<1x128xf32>
    %20 = vector.broadcast %19 : vector<1x128xf32> to vector<256x128xf32>
    %21 = arith.addf %18, %20 : vector<256x128xf32>
    %c0_17 = arith.constant 0 : index
    %c0_18 = arith.constant 0 : index
    %22 = vector.load %arg8[%c0_17, %c0_18] : memref<256x128xf32, #tpu.memory_space<vmem>>, vector<256x128xf32>
    tpu.vector_store %arg8[%c0_17, %c0_18], %21 {strides = array<i32>} : memref<256x128xf32, #tpu.memory_space<vmem>>, vector<256x128xf32>,
    return
  }
  func.func @transform_0(%arg0: i32) -> (i32, i32) {
    %c0_i32 = arith.constant 0 : i32
    %c0_i32_0 = arith.constant 0 : i32
    return %arg0, %c0_i32 : i32, i32
  }
  func.func @transform_1(%arg0: i32) -> (i32, i32) {
    %c0_i32 = arith.constant 0 : i32
    %c0_i32_0 = arith.constant 0 : i32
    %c0_i32_1 = arith.constant 0 : i32
    return %c0_i32, %c0_i32_0 : i32, i32
  }
  func.func @transform_2(%arg0: i32) -> (i32, i32) {
    %c0_i32 = arith.constant 0 : i32
    %c0_i32_0 = arith.constant 0 : i32
    %c0_i32_1 = arith.constant 0 : i32
    return %c0_i32, %c0_i32_0 : i32, i32
  }
  func.func @transform_3(%arg0: i32) -> (i32, i32) {
    %c0_i32 = arith.constant 0 : i32
    %c0_i32_0 = arith.constant 0 : i32
    %c0_i32_1 = arith.constant 0 : i32
    return %c0_i32, %c0_i32_0 : i32, i32
  }
  func.func @transform_4(%arg0: i32) -> (i32, i32) {
    %c0_i32 = arith.constant 0 : i32
    %c0_i32_0 = arith.constant 0 : i32
    %c0_i32_1 = arith.constant 0 : i32
    return %c0_i32, %c0_i32_0 : i32, i32
  }
  func.func @transform_5(%arg0: i32) -> (i32, i32) {
    %c0_i32 = arith.constant 0 : i32
    %c0_i32_0 = arith.constant 0 : i32
    %c0_i32_1 = arith.constant 0 : i32
    return %c0_i32, %c0_i32_0 : i32, i32
  }
  func.func @transform_6(%arg0: i32) -> (i32, i32) {
    %c0_i32 = arith.constant 0 : i32
    %c0_i32_0 = arith.constant 0 : i32
    %c0_i32_1 = arith.constant 0 : i32
    return %c0_i32, %c0_i32_0 : i32, i32
  }
  func.func @transform_7(%arg0: i32) -> (i32, i32) {
    %c0_i32 = arith.constant 0 : i32
    %c0_i32_0 = arith.constant 0 : i32
    return %arg0, %c0_i32 : i32, i32
  }
}

</mosaic_0001>

<bundles_post_ra>
// kernel: tpu_custom_call.1
= control target key start
LH: loop header
LB: loop body
LE: loop exit
PB: predicated region body
PF: predicated region fallthrough
CT: control target
= control target key end

     0   :  { %s2451_s0 = inlined_call_operand.hbm [shape: bf16[512,128], index: 0, kind: input, shape index: {}]   ;;  %s2452_s1 = inlined_call_operand.hbm [shape: bf16[128,128], index: 1, kind: input, shape index: {}]   ;;  %s2453_s2 = inlined_call_operand.vmem [shape: f32[1,128], index: 2, kind: input, shape index: {}]   ;;  %s2454_s3 = inlined_call_operand.hbm [shape: bf16[128,128], index: 3, kind: input, shape index: {}]   ;;  %s2455_s4 = inlined_call_operand.vmem [shape: f32[1,128], index: 4, kind: input, shape index: {}]   ;;  %s2456_s5 = inlined_call_operand.hbm [shape: bf16[128,128], index: 5, kind: input, shape index: {}]   ;;  %s2457_s6 = inlined_call_operand.vmem [shape: f32[1,128], index: 6, kind: input, shape index: {}]   ;;  %s2458_s7 = inlined_call_operand.hbm [shape: f32[512,128], index: 7, kind: output, shape index: {}]  }
   0x1   :  { %2465 = sst [smem:[#allocation15_spill]] %s2452_s1 }
   0x2   :  { %12 = vsyncpa [#allocation3], 0 }
   0x3   :  { %14 = vsyncpa [#allocation3 + $0x1], 0 }
   0x4   :  { %15 = vsyncpa [#allocation6], 0 }
   0x5   :  { %16 = vsyncpa [#allocation9], 0 }
   0x6   :  { %17 = vsyncpa [#allocation4], 0 }
   0x7   :  { %19 = vsyncpa [#allocation4 + $0x1], 0  ;;  %s2059_s24 = smov 0   ;;  %s2061_s25 = smov 0  }
   0x8   :  { %s2063_s26 = smov 0   ;;  %s2065_s27 = smov 0  }
   0x9 LB: > { %s2080_s28 = sadd.s32 4294967295, %s2008_s27   ;;  %s1412_s29 = sadd.s32 4294967294, %s2008_s27   ;;  %s2008_s27 = sphi %s2065_s27, %s2487_s27   ;;  %s2004_s26 = sphi %s2063_s26, %s2486_s26   ;;  %s2000_s25 = sphi %s2061_s25, %s2485_s25   ;;  %s1996_s24 = sphi %s2059_s24, %s2484_s24  }
   0xa   : > { %p45_p0 = scmp.ne.s32.totalorder %s2000_s25, %s1996_s24  ;;  %p2459_p1 = scmp.eq.s32.totalorder %s2080_s28, 0 }
   0xb   : > { %p195_p2 = scmp.eq.s32.totalorder %s2080_s28, 1  ;;  %p201_p3 = scmp.eq.s32.totalorder %s1412_s29, 1 }
   0xc   : > { %p2089_p4 = por %p2459_p1, %p45_p0  ;;  %p1413_p5 = scmp.ge.s32.totalorder %s2008_s27, 1 }
   0xd   : > { %p2094_p6 = por %p201_p3, %p45_p0  ;;  %p208_p7 = scmp.lt.s32.totalorder %s2008_s27, 3 }
   0xe   : > { %s2466_s30 = scalar_select %p2089_p4, 1, 0 }
   0xf   : > { %s2467_s8 = scalar_select %p2094_p6, 1, 0 }
  0x10   : > { %p2099_p8 = pnand %p1413_p5, %p208_p7  ;;  %s2010_s10 = smov [#allocation5]  }
  0x11   : > { %s220_s11 = sshll.u32 %s2010_s10, 4  ;;  %s2011_s13 = smov [#allocation7]   ;;  %s221_s11 = int_to_ptr.vmem [resolvable:$true] %s220_s11 }
  0x12   : > { %s2468_s9 = scalar_select %p2099_p8, 1, 0 }
  0x13   : > { %p1725_p9 = pneg %p2099_p8  ;;  %s236_s14 = sshll.u32 %s2011_s13, 4  ;;  %s237_s14 = int_to_ptr.vmem [resolvable:$true] %s236_s14 }
  0x14   : > { %s2012_s15 = smov [#allocation8]   ;;  %s1841_s17 = scalar_lea.vmem %s221_s11, 1024 }
  0x15   : > { %p2108_p11 = pnand %p1725_p9, %p2459_p1  ;;  %s252_s16 = sshll.u32 %s2012_s15, 4  ;;  %s253_s16 = int_to_ptr.vmem [resolvable:$true] %s252_s16 }
  0x16   : > { %p1842_p13 = scmp.ne.s32.totalorder %s221_s11, %s1841_s17  ;;  %p1849_p5 = scmp.lt.s32.totalorder %s221_s11, %s221_s11 }
  0x17   : > { %p1832_p12 = pneg %p2108_p11  ;;  %p1850_p7 = scmp.lt.s32.totalorder %s1841_s17, %s1841_s17 }
  0x19   : > { %p1844_p0 = pnand %p1842_p13, %p1832_p12  ;;  %p1851_p9 = por %p1850_p7, %p1849_p5 }
  0x1b   : > { %p1845_p3 = pneg %p1844_p0 }
  0x1d   : > { %p1852_p10 = pnand %p1851_p9, %p1845_p3 }
  0x1f   : > { %1855 = shalt.err (!%p1852_p10)
}
  0x20   : > { %s2460_s18 = smov 64   ;;  %s2461_s19 = smov 4  }
  0x21   : > { %s2470_s1 = sld [smem:[#allocation15_spill]]  ;;  %s1867_s22 = scalar_lea.vmem %s237_s14, 1024 }
  0x22   : > { %p1868_p13 = scmp.ne.s32.totalorder %s237_s14, %s1867_s22  ;;  %p1875_p3 = scmp.lt.s32.totalorder %s237_s14, %s237_s14 }
  0x23   : > { %p1876_p10 = scmp.lt.s32.totalorder %s1867_s22, %s1867_s22 }
  0x24   : > { %p1870_p0 = pnand %p1868_p13, %p1832_p12 }
  0x25   : > { %p1877_p7 = por %p1876_p10, %p1875_p3 }
  0x26   : > { %p1871_p5 = pneg %p1870_p0 }
  0x27   : > { %1728 = dma.hbm_to_vmem [thread:$0]  (!%p2108_p11), %s2470_s1, 1024, %s221_s11, [#allocation6], %s2460_s18, %s2460_s18, %s2461_s19  }
  0x28   : > { %p1878_p9 = pnand %p1877_p7, %p1871_p5 }
  0x2a   : > { %1881 = shalt.err (!%p1878_p9)
}
  0x2b   : > { %1731 = dma.hbm_to_vmem [thread:$0]  (!%p2108_p11), %s2454_s3, 1024, %s237_s14, [#allocation6], %s2460_s18, %s2460_s18, %s2461_s19  }
  0x2c   : > { %s1893_s10 = scalar_lea.vmem %s253_s16, 1024  ;;  %p1901_p3 = scmp.lt.s32.totalorder %s253_s16, %s253_s16 }
  0x2d   : > { %p1894_p1 = scmp.ne.s32.totalorder %s253_s16, %s1893_s10  ;;  %p1902_p5 = scmp.lt.s32.totalorder %s1893_s10, %s1893_s10 }
  0x2f   : > { %p1896_p13 = pnand %p1894_p1, %p1832_p12  ;;  %p1903_p10 = por %p1902_p5, %p1901_p3 }
  0x31   : > { %p1897_p0 = pneg %p1896_p13 }
  0x33   : > { %p1904_p7 = pnand %p1903_p10, %p1897_p0 }
  0x35   : > { %1907 = shalt.err (!%p1904_p7)
}
  0x36   : > { %1734 = dma.hbm_to_vmem [thread:$0]  (!%p2108_p11), %s2456_s5, 1024, %s253_s16, [#allocation9], %s2460_s18, %s2460_s18, %s2461_s19  }
  0x37   : > { %s2148_s14 = sadd.s32 1, %s2008_s27   ;;  %s32_s15 = sadd.s32 1, %s2004_s26 }
  0x38   : > { %s29_s12 = ssub.s32 %s2008_s27, %s2148_s14  ;;  %p39_p12 = scmp.ne.s32.totalorder %s2004_s26, %s2000_s25 }
  0x39   : > { %p30_p1 = scmp.eq.s32.totalorder %s29_s12, 0  ;;  %p40_p9 = scmp.eq.s32.totalorder %s2008_s27, 0 }
  0x3a   : > { %p1746_p13 = scmp.lt.s32.totalorder %s2008_s27, 2  ;;  %p2162_p3 = por %p195_p2, %p39_p12 }
  0x3b   : > { %s2158_s17 = scalar_select %p30_p1, %s2004_s26, %s32_s15  }
  0x3c   : > { %p41_p0 = por %p40_p9, %p39_p12  ;;  %s269_s21 = sand.u32 1, %s2004_s26  }
  0x3d   : > { %s2471_s20 = scalar_select %p2162_p3, 1, 0 }
  0x3e   : > { %s1475_s22 = sshll.u32 %s2008_s27, 11  ;;  %s1418_s16 = sshll.u32 %s269_s21, 7 }
  0x3f   : > { %s2171_s10 = scalar_lea.hbm %s2451_s0, %s1475_s22  ;;  %s273_s11 = scalar_lea.vmem [#allocation2], %s1418_s16 }
  0x40   : > { %s280_s13 = sshll.u32 %s273_s11, 4  ;;  %p2173_p11 = pnand %p1746_p13, %p41_p0  ;;  %s2177_s13 = int_to_ptr.vmem [resolvable:$true] %s280_s13 }
  0x41   : > { %s2179_s15 = scalar_lea.sflag [#allocation3], %s269_s21  ;;  %s1908_s18 = scalar_lea.hbm %s2171_s10, 2048 }
  0x42   : > { %p1909_p2 = scmp.ne.s32.totalorder %s2171_s10, %s1908_s18  ;;  %p1910_p5 = pneg %p2173_p11 }
  0x43   : > { %s1913_s16 = scalar_lea.hbm %s2451_s0, 4096  ;;  %p1914_p1 = scmp.lt.s32.totalorder %s2171_s10, %s2451_s0 }
  0x44   : > { %p1911_p10 = pnand %p1910_p5, %p1909_p2  ;;  %p1915_p12 = scmp.lt.s32.totalorder %s1913_s16, %s1908_s18 }
  0x46   : > { %p1912_p7 = pneg %p1911_p10  ;;  %p1916_p9 = por %p1915_p12, %p1914_p1 }
  0x48   : > { %p1917_p13 = pnand %p1916_p9, %p1912_p7 }
  0x4a   : > { %1920 = shalt.err (!%p1917_p13)
}
  0x4b   : > { %s1921_s21 = scalar_lea.vmem %s2177_s13, 2048  ;;  %s2015_s19 = smov [#allocation2]  }
  0x4c   : > { %p1922_p0 = scmp.ne.s32.totalorder %s2177_s13, %s1921_s21  ;;  %s1926_s1 = sshll.u32 %s2015_s19, 4  ;;  %s1927_s1 = int_to_ptr.vmem [resolvable:$false] %s1926_s1 }
  0x4d   : > { %s1928_s22 = scalar_lea.vmem %s1927_s1, 4096  ;;  %p1929_p10 = scmp.lt.s32.totalorder %s2177_s13, %s1927_s1 }
  0x4e   : > { %p1924_p6 = pnand %p1922_p0, %p1910_p5  ;;  %p1930_p3 = scmp.lt.s32.totalorder %s1928_s22, %s1921_s21 }
  0x50   : > { %p1925_p2 = pneg %p1924_p6  ;;  %p1931_p4 = por %p1930_p3, %p1929_p10 }
  0x52   : > { %p1932_p8 = pnand %p1931_p4, %p1925_p2 }
  0x54   : > { %1935 = shalt.err (!%p1932_p8)
}
  0x55   : > { %s2473_s18 = smov 4   ;;  %s2474_s23 = smov 64  }
  0x56   : > { %1738 = dma.hbm_to_vmem [thread:$0]  (!%p2173_p11), %s2171_s10, 2048, %s2177_s13, %s2179_s15, %s2474_s23, %s2474_s23, %s2473_s18  }
  0x57   : > { %p2475_p6 = scmp.ne.s32.totalorder %s2468_s9, 0 }
  0x58   : > { %s2206_s19 = sand.u32 (!%p2475_p6), 1, %s2000_s25   ;;  %p2476_p4 = scmp.ne.s32.totalorder (!%p2475_p6), %s2466_s30, 0 }
  0x59   : > { %292 = sbr.rel (%p2475_p6) target bundleno = 818 (0x332), region = 48  ;;  %s1422_s1 = sshll.u32 (!%p2475_p6), %s2206_s19, 7 }
  0x5a   : > { %s295_s16 = scalar_lea.sflag (!%p2475_p6), [#allocation3], %s2206_s19  ;;  %s2210_s29 = scalar_lea.vmem (!%p2475_p6), [#allocation2], %s1422_s1 }
  0x5e   : > { %1979 = dma.done.wait (%p2476_p4), %s295_s16, 2048  }
  0x5f   : > { %1981 = vsyncadd (%p2476_p4), %s295_s16, 4294965248  ;;  %p2477_p8 = scmp.eq.s32.totalorder %s2080_s28, 0 }
  0x61   : > { %1983 = dma.done.wait (%p2477_p8), [#allocation6], 2048   ;;  %p2478_p3 = pmov %p2477_p8 }
  0x63   : > { %1985 = vsyncadd (%p2478_p3), [#allocation6], 4294965248  ;;  %p2479_p11 = pmov %p2478_p3 }
  0x64   : > { %p2480_p5 = pmov %p2478_p3 }
  0x65   : > { %1987 = dma.done.wait (%p2479_p11), [#allocation9], 1024  }
  0x66   : > { %1989 = vsyncadd (%p2480_p5), [#allocation9], 4294966272  ;;  %v1790_v0 = vld [vmem:[#allocation5 + $0x38] sm:$0xff]   ;;  %v1791_v1 = vld [vmem:[#allocation5 + $0x30] sm:$0xff]   ;;  %s1426_s12 = sshll.u32 %s2206_s19, 8  ;;  %s1476_s22 = sshll.u32 %s2080_s28, 12 }
  0x67   : > { %1549 = vmatprep.subr.bf16.mxu0 %v1790_v0  ;;  %1693 = vmatprep.subr.bf16.mxu1 %v1790_v0  ;;  %v1792_v2 = vld [vmem:[#allocation5 + $0x28] sm:$0xff]   ;;  %v1793_v3 = vld [vmem:[#allocation5 + $0x20] sm:$0xff]   ;;  %v1794_v5 = vld [vmem:[#allocation5 + $0x18] sm:$0xff]   ;;  %s2336_s21 = scalar_lea.vmem [#allocation10], %s1426_s12  ;;  %s2403_s16 = scalar_lea.hbm %s2458_s7, %s1476_s22 }
  0x68   : > { %1550 = vmatpush3.bf16.msra.mxu0 %v1790_v0  ;;  %1701 = vmatpush3.bf16.msra.mxu1 %v1790_v0  ;;  %v1798_v4 = vld [vmem:[%s2210_s29] sm:$0xff]   ;;  %v1795_v6 = vld [vmem:[#allocation5 + $0x10] sm:$0xff]   ;;  %v1796_v8 = vld [vmem:[#allocation5 + $0x8] sm:$0xff]   ;;  %s1310_s18 = sshll.u32 %s2336_s21, 4  ;;  %s1297_s28 = scalar_lea.sflag [#allocation4], %s2206_s19  ;;  %s2405_s18 = int_to_ptr.vmem [resolvable:$true] %s1310_s18 }
  0x69   : > { %1551 = vmatprep.subr.bf16.mxu0 %v1791_v1  ;;  %1694 = vmatprep.subr.bf16.mxu1 %v1791_v1  ;;  %v1806_v7 = vld [vmem:[%s2210_s29 + $0x40] sm:$0xff]   ;;  %v1799_v10 = vld [vmem:[%s2210_s29 + $0x8] sm:$0xff]   ;;  %v1814_v12 = vld [vmem:[#allocation7 + $0x38] sm:$0xff]   ;;  %p2481_p1 = scmp.ne.s32.totalorder %s2471_s20, 0  ;;  %s2016_s30 = smov [#allocation10]  }
  0x6a   : > { %1565 = vmatprep.mubr.bf16.mxu0 %v1798_v4  ;;  %1581 = vmatprep.mubr.bf16.mxu1 %v1806_v7  ;;  %v1797_v9 = vld [vmem:[#allocation5] sm:$0xff]   ;;  %v1807_v11 = vld [vmem:[%s2210_s29 + $0x48] sm:$0xff]   ;;  %v1800_v13 = vld [vmem:[%s2210_s29 + $0x10] sm:$0xff]   ;;  %s1940_s9 = sshll.u32 %s2016_s30, 4  ;;  %s1941_s9 = int_to_ptr.vmem [resolvable:$false] %s1940_s9 }
  0x6b   : > { %v1808_v14 = vld [vmem:[%s2210_s29 + $0x50] sm:$0xff]   ;;  %v1816_v16 = vld [vmem:[#allocation7 + $0x28] sm:$0xff]   ;;  %v1801_v17 = vld [vmem:[%s2210_s29 + $0x18] sm:$0xff]   ;;  %s1942_s10 = scalar_lea.vmem %s1941_s9, 8192  ;;  %p1943_p13 = scmp.lt.s32.totalorder %s2405_s18, %s1941_s9 }
  0x6c   : > { %1552 = vmatpush3.bf16.msra.mxu0 %v1791_v1  ;;  %1702 = vmatpush3.bf16.msra.mxu1 %v1791_v1  ;;  %v1815_v15 = vld [vmem:[#allocation7 + $0x30] sm:$0xff]   ;;  %v1809_v18 = vld [vmem:[%s2210_s29 + $0x58] sm:$0xff]   ;;  %v1802_v19 = vld [vmem:[%s2210_s29 + $0x20] sm:$0xff]  }
  0x6d   : > { %1553 = vmatprep.subr.bf16.mxu0 %v1792_v2  ;;  %1695 = vmatprep.subr.bf16.mxu1 %v1792_v2  ;;  %v1810_v20 = vld [vmem:[%s2210_s29 + $0x60] sm:$0xff]   ;;  %v1818_v22 = vld [vmem:[#allocation7 + $0x18] sm:$0xff]   ;;  %v1803_v23 = vld [vmem:[%s2210_s29 + $0x28] sm:$0xff]  }
  0x6e   : > { %v1817_v21 = vld [vmem:[#allocation7 + $0x20] sm:$0xff]   ;;  %v1811_v24 = vld [vmem:[%s2210_s29 + $0x68] sm:$0xff]   ;;  %v1804_v25 = vld [vmem:[%s2210_s29 + $0x30] sm:$0xff]  }
  0x6f   : > { %v1812_v26 = vld [vmem:[%s2210_s29 + $0x70] sm:$0xff]   ;;  %v1805_v27 = vld [vmem:[%s2210_s29 + $0x38] sm:$0xff]   ;;  %v1820_v30 = vld [vmem:[#allocation7 + $0x8] sm:$0xff]  }
  0x70   : > { %1554 = vmatpush3.bf16.msra.mxu0 %v1792_v2  ;;  %1703 = vmatpush3.bf16.msra.mxu1 %v1792_v2  ;;  %v1813_v28 = vld [vmem:[%s2210_s29 + $0x78] sm:$0xff]   ;;  %v1819_v29 = vld [vmem:[#allocation7 + $0x10] sm:$0xff]   ;;  %v1821_v31 = vld [vmem:[#allocation7] sm:$0xff]   ;;  %s1936_s29 = scalar_lea.vmem %s2405_s18, 4096 }
  0x71   : > { %1555 = vmatprep.subr.bf16.mxu0 %v1793_v3  ;;  %1696 = vmatprep.subr.bf16.mxu1 %v1793_v3  ;;  %v1822_v32 = vld [vmem:[#allocation8 + $0x38] sm:$0xff]   ;;  %v1823_v33 = vld [vmem:[#allocation8 + $0x30] sm:$0xff]   ;;  %v1824_v34 = vld [vmem:[#allocation8 + $0x28] sm:$0xff]   ;;  %p1937_p7 = scmp.ne.s32.totalorder %s2405_s18, %s1936_s29  ;;  %p1944_p0 = scmp.lt.s32.totalorder %s1942_s10, %s1936_s29 }
  0x72   : > { %v1825_v35 = vld [vmem:[#allocation8 + $0x20] sm:$0xff]   ;;  %v1826_v36 = vld [vmem:[#allocation8 + $0x18] sm:$0xff]  }
  0x73   : > { %v2245_v41 = vld [vmem:[%s2453_s2] ss:$0 sm:$0xff]  ;;  %p1938_p12 = pnand %p1937_p7, %p2481_p1  ;;  %p1945_p2 = por %p1944_p0, %p1943_p13 }
  0x74   : > { %1556 = vmatpush3.bf16.msra.mxu0 %v1793_v3  ;;  %1704 = vmatpush3.bf16.msra.mxu1 %v1793_v3 }
  0x75   : > { %1557 = vmatprep.subr.bf16.mxu0 %v1794_v5  ;;  %1697 = vmatprep.subr.bf16.mxu1 %v1794_v5  ;;  %p1939_p9 = pneg %p1938_p12 }
  0x77   : > { %p1946_p10 = pnand %p1945_p2, %p1939_p9 }
  0x78   : > { %1558 = vmatpush3.bf16.msra.mxu0 %v1794_v5  ;;  %1705 = vmatpush3.bf16.msra.mxu1 %v1794_v5 }
  0x79   : > { %1559 = vmatprep.subr.bf16.mxu0 %v1795_v6  ;;  %1698 = vmatprep.subr.bf16.mxu1 %v1795_v6 }
  0x7c   : > { %1560 = vmatpush3.bf16.msra.mxu0 %v1795_v6  ;;  %1706 = vmatpush3.bf16.msra.mxu1 %v1795_v6 }
  0x7d   : > { %1561 = vmatprep.subr.bf16.mxu0 %v1796_v8  ;;  %1699 = vmatprep.subr.bf16.mxu1 %v1796_v8 }
  0x80   : > { %1562 = vmatpush3.bf16.msra.mxu0 %v1796_v8  ;;  %1707 = vmatpush3.bf16.msra.mxu1 %v1796_v8 }
  0x81   : > { %1563 = vmatprep.subr.bf16.mxu0 %v1797_v9  ;;  %1700 = vmatprep.subr.bf16.mxu1 %v1797_v9 }
  0x84   : > { %1564 = vmatpush3.bf16.msra.mxu0 %v1797_v9  ;;  %1708 = vmatpush3.bf16.msra.mxu1 %v1797_v9 }
  0x85   : > { %1597 = vmatprep.subr.bf16.mxu1 %v1814_v12  ;;  %1645 = vmatprep.subr.bf16.mxu0 %v1822_v32 }
  0x87   : > { %1566 = vmatmul.mubr.bf16.vlgmr.msra.gmra.mxu0 %v1799_v10  ;;  %1582 = vmatmul.mubr.bf16.vlgmr.msra.gmra.mxu1 %v1807_v11 }
  0x88   : > { %1569 = vmatprep.mubr.bf16.mxu0 %v1800_v13  ;;  %1585 = vmatprep.mubr.bf16.mxu1 %v1808_v14 }
  0x89   : > { %1598 = vmatpush3.bf16.msra.mxu1 %v1814_v12  ;;  %1646 = vmatpush3.bf16.msra.mxu0 %v1822_v32 }
  0x8a   : > { %1599 = vmatprep.subr.bf16.mxu1 %v1815_v15  ;;  %1647 = vmatprep.subr.bf16.mxu0 %v1823_v33 }
  0x8d   : > { %1600 = vmatpush3.bf16.msra.mxu1 %v1815_v15  ;;  %1648 = vmatpush3.bf16.msra.mxu0 %v1823_v33 }
  0x8e   : > { %1601 = vmatprep.subr.bf16.mxu1 %v1816_v16  ;;  %1649 = vmatprep.subr.bf16.mxu0 %v1824_v34 }
  0x8f   : > { %1570 = vmatmul.mubr.bf16.gmra.mxu0 %v1801_v17  ;;  %1586 = vmatmul.mubr.bf16.gmra.mxu1 %v1809_v18 }
  0x90   : > { %1573 = vmatprep.mubr.bf16.mxu0 %v1802_v19  ;;  %1589 = vmatprep.mubr.bf16.mxu1 %v1810_v20 }
  0x91   : > { %1602 = vmatpush3.bf16.msra.mxu1 %v1816_v16  ;;  %1650 = vmatpush3.bf16.msra.mxu0 %v1824_v34 }
  0x92   : > { %1603 = vmatprep.subr.bf16.mxu1 %v1817_v21  ;;  %1651 = vmatprep.subr.bf16.mxu0 %v1825_v35 }
  0x95   : > { %1604 = vmatpush3.bf16.msra.mxu1 %v1817_v21  ;;  %1652 = vmatpush3.bf16.msra.mxu0 %v1825_v35 }
  0x96   : > { %1605 = vmatprep.subr.bf16.mxu1 %v1818_v22  ;;  %1653 = vmatprep.subr.bf16.mxu0 %v1826_v36 }
  0x97   : > { %1574 = vmatmul.mubr.bf16.gmra.mxu0 %v1803_v23  ;;  %1590 = vmatmul.mubr.bf16.gmra.mxu1 %v1811_v24 }
  0x98   : > { %1577 = vmatprep.mubr.bf16.mxu0 %v1804_v25  ;;  %1593 = vmatprep.mubr.bf16.mxu1 %v1812_v26 }
  0x99   : > { %1606 = vmatpush3.bf16.msra.mxu1 %v1818_v22  ;;  %1654 = vmatpush3.bf16.msra.mxu0 %v1826_v36 }
  0x9a   : > { %1607 = vmatprep.subr.bf16.mxu1 %v1819_v29 }
  0x9d   : > { %1608 = vmatpush3.bf16.msra.mxu1 %v1819_v29 }
  0x9e   : > { %1609 = vmatprep.subr.bf16.mxu1 %v1820_v30 }
  0x9f   : > { %1578 = vmatmul.mubr.bf16.gmra.mxu0 %v1805_v27  ;;  %1594 = vmatmul.mubr.bf16.gmra.mxu1 %v1813_v28 }
  0xa1   : > { %1610 = vmatpush3.bf16.msra.mxu1 %v1820_v30 }
  0xa2   : > { %1611 = vmatprep.subr.bf16.mxu1 %v1821_v31 }
  0xa5   : > { %1612 = vmatpush3.bf16.msra.mxu1 %v1821_v31 }
 0x147   : > { %v1567_v37 = vpop.f32.mrf.mxu0  ;;  %v2240_v38 = vpop.f32.mrf.mxu1 }
 0x148   : > { %v586_v46 = vadd.f32 %v1567_v37, %v2245_v41 }
 0x149   : > { %v577_v39 = vpop.f32.mrf.mxu0  ;;  %v641_v40 = vpop.f32.mrf.mxu1 }
 0x14a   : > { %v578_v44 = vadd.f32 %v2245_v41, %v577_v39  ;;  %v706_v55 = vmax.f32 %v586_v46, 0.0  ;;  %v642_v27 = vadd.f32 %v2245_v41, %v641_v40 }
 0x14b   : > { %v1568_v42 = vpop.f32.mrf.mxu0  ;;  %v2247_v43 = vpop.f32.mrf.mxu1 }
 0x14c   : > { %v589_v45 = vadd.f32 %v1568_v42, %v2245_v41  ;;  %v704_v53 = vmax.f32 %v578_v44, 0.0  ;;  %v720_v36 = vmax.f32 %v642_v27, 0.0 }
 0x14d   : > { %v580_v47 = vpop.f32.mrf.mxu0  ;;  %v644_v48 = vpop.f32.mrf.mxu1 }
 0x14e   : > { %v581_v49 = vadd.f32 %v2245_v41, %v580_v47  ;;  %v707_v50 = vmax.f32 %v589_v45, 0.0  ;;  %v645_v28 = vadd.f32 %v2245_v41, %v644_v48 }
 0x14f   : > { %v1571_v51 = vpop.f32.mrf.mxu0  ;;  %v2253_v52 = vpop.f32.mrf.mxu1 }
 0x150   : > { %v705_v54 = vmax.f32 %v581_v49, 0.0  ;;  %v737_v59 = vpack.c.bf16 %v707_v50, %v706_v55  ;;  %v602_v0 = vadd.f32 %v1571_v51, %v2245_v41  ;;  %v721_v39 = vmax.f32 %v645_v28, 0.0 }
 0x151   : > { %v593_v56 = vpop.f32.mrf.mxu0  ;;  %v657_v57 = vpop.f32.mrf.mxu1  ;;  %v650_v51 = vadd.f32 %v2240_v38, %v2245_v41  ;;  %v666_v38 = vadd.f32 %v2253_v52, %v2245_v41 }
 0x152   : > { %v736_v58 = vpack.c.bf16 %v705_v54, %v704_v53  ;;  %v594_v62 = vadd.f32 %v2245_v41, %v593_v56  ;;  %v710_v8 = vmax.f32 %v602_v0, 0.0  ;;  %v744_v48 = vpack.c.bf16 %v721_v39, %v720_v36 }
 0x153   : > { %v1572_v60 = vpop.f32.mrf.mxu0  ;;  %v2255_v61 = vpop.f32.mrf.mxu1  ;;  %v658_v49 = vadd.f32 %v2245_v41, %v657_v57  ;;  %v653_v54 = vadd.f32 %v2247_v43, %v2245_v41 }
 0x154   : > { %v605_v63 = vadd.f32 %v1572_v60, %v2245_v41  ;;  %1613 = vmatprep.mubr.bf16.mxu1 %v736_v58  ;;  %v708_v6 = vmax.f32 %v594_v62, 0.0  ;;  %v669_v43 = vadd.f32 %v2255_v61, %v2245_v41 }
 0x155   : > { %v596_v1 = vpop.f32.mrf.mxu0  ;;  %1614 = vmatmul.mubr.bf16.vlgmr.msra.gmra.mxu1 %v737_v59  ;;  %v660_v5 = vpop.f32.mrf.mxu1  ;;  %v724_v56 = vmax.f32 %v658_v49, 0.0  ;;  %v722_v59 = vmax.f32 %v650_v51, 0.0  ;;  %v723_v60 = vmax.f32 %v653_v54, 0.0 }
 0x156   : > { %v597_v2 = vadd.f32 %v2245_v41, %v596_v1  ;;  %v711_v3 = vmax.f32 %v605_v63, 0.0  ;;  %v661_v50 = vadd.f32 %v2245_v41, %v660_v5  ;;  %v726_v5 = vmax.f32 %v666_v38, 0.0 }
 0x157   : > { %v1575_v4 = vpop.f32.mrf.mxu0  ;;  %v2261_v13 = vpop.f32.mrf.mxu1  ;;  %v745_v1 = vpack.c.bf16 %v723_v60, %v722_v59 }
 0x158   : > { %v709_v7 = vmax.f32 %v597_v2, 0.0  ;;  %v739_v11 = vpack.c.bf16 %v711_v3, %v710_v8  ;;  %v618_v16 = vadd.f32 %v1575_v4, %v2245_v41  ;;  %v725_v58 = vmax.f32 %v661_v50, 0.0 }
 0x159   : > { %v609_v9 = vpop.f32.mrf.mxu0  ;;  %v673_v21 = vpop.f32.mrf.mxu1  ;;  %v682_v52 = vadd.f32 %v2261_v13, %v2245_v41  ;;  %v1827_v13 = vld [vmem:[#allocation8 + $0x10] sm:$0xff]  }
 0x15a   : > { %v738_v10 = vpack.c.bf16 %v709_v7, %v708_v6  ;;  %v610_v14 = vadd.f32 %v2245_v41, %v609_v9  ;;  %v714_v24 = vmax.f32 %v618_v16, 0.0  ;;  %v746_v63 = vpack.c.bf16 %v725_v58, %v724_v56  ;;  %1655 = vmatprep.subr.bf16.mxu0 %v1827_v13 }
 0x15b   : > { %v1576_v12 = vpop.f32.mrf.mxu0  ;;  %v1592_v31 = vpop.f32.mrf.mxu1  ;;  %v674_v57 = vadd.f32 %v2245_v41, %v673_v21  ;;  %v727_v6 = vmax.f32 %v669_v43, 0.0  ;;  %1656 = vmatpush3.bf16.msra.mxu0 %v1827_v13 }
 0x15c   : > { %v621_v15 = vadd.f32 %v1576_v12, %v2245_v41  ;;  %1617 = vmatprep.mubr.bf16.mxu1 %v738_v10  ;;  %v712_v22 = vmax.f32 %v610_v14, 0.0  ;;  %v685_v12 = vadd.f32 %v1592_v31, %v2245_v41 }
 0x15d   : > { %v612_v17 = vpop.f32.mrf.mxu0  ;;  %1618 = vmatmul.mubr.bf16.gmra.mxu1 %v739_v11  ;;  %v676_v40 = vpop.f32.mrf.mxu1  ;;  %v728_v3 = vmax.f32 %v674_v57, 0.0  ;;  %v747_v11 = vpack.c.bf16 %v727_v6, %v726_v5 }
 0x15e   : > { %v613_v18 = vadd.f32 %v2245_v41, %v612_v17  ;;  %v715_v19 = vmax.f32 %v621_v15, 0.0  ;;  %v677_v0 = vadd.f32 %v2245_v41, %v676_v40  ;;  %v730_v15 = vmax.f32 %v682_v52, 0.0 }
 0x15f   : > { %v1579_v20 = vpop.f32.mrf.mxu0  ;;  %v1595_v55 = vpop.f32.mrf.mxu1  ;;  %v731_v16 = vmax.f32 %v685_v12, 0.0 }
 0x160   : > { %v713_v23 = vmax.f32 %v613_v18, 0.0  ;;  %v741_v29 = vpack.c.bf16 %v715_v19, %v714_v24  ;;  %v634_v34 = vadd.f32 %v1579_v20, %v2245_v41  ;;  %v729_v4 = vmax.f32 %v677_v0, 0.0  ;;  %v1828_v24 = vld [vmem:[#allocation8 + $0x8] sm:$0xff]  }
 0x161   : > { %v625_v25 = vpop.f32.mrf.mxu0  ;;  %v689_v62 = vpop.f32.mrf.mxu1  ;;  %v749_v18 = vpack.c.bf16 %v731_v16, %v730_v15  ;;  %v698_v19 = vadd.f32 %v1595_v55, %v2245_v41  ;;  %1657 = vmatprep.subr.bf16.mxu0 %v1828_v24 }
 0x162   : > { %v740_v26 = vpack.c.bf16 %v713_v23, %v712_v22  ;;  %v626_v32 = vadd.f32 %v2245_v41, %v625_v25  ;;  %v718_v46 = vmax.f32 %v634_v34, 0.0  ;;  %v748_v8 = vpack.c.bf16 %v729_v4, %v728_v3  ;;  %1658 = vmatpush3.bf16.msra.mxu0 %v1828_v24  ;;  %v1829_v25 = vld [vmem:[#allocation8] sm:$0xff]  }
 0x163   : > { %v1580_v30 = vpop.f32.mrf.mxu0  ;;  %v1596_v2 = vpop.f32.mrf.mxu1  ;;  %v690_v9 = vadd.f32 %v2245_v41, %v689_v62  ;;  %v734_v21 = vmax.f32 %v698_v19, 0.0  ;;  %1659 = vmatprep.subr.bf16.mxu0 %v1829_v25 }
 0x164   : > { %v637_v33 = vadd.f32 %v1580_v30, %v2245_v41  ;;  %1621 = vmatprep.mubr.bf16.mxu1 %v740_v26  ;;  %v716_v44 = vmax.f32 %v626_v32, 0.0  ;;  %v701_v20 = vadd.f32 %v1596_v2, %v2245_v41 }
 0x165   : > { %v628_v35 = vpop.f32.mrf.mxu0  ;;  %1622 = vmatmul.mubr.bf16.gmra.mxu1 %v741_v29  ;;  %v692_v7 = vpop.f32.mrf.mxu1  ;;  %v732_v61 = vmax.f32 %v690_v9, 0.0 }
 0x166   : > { %v629_v37 = vadd.f32 %v2245_v41, %v628_v35  ;;  %v719_v42 = vmax.f32 %v637_v33, 0.0  ;;  %v693_v10 = vadd.f32 %v2245_v41, %v692_v7  ;;  %v735_v22 = vmax.f32 %v701_v20, 0.0  ;;  %1660 = vmatpush3.bf16.msra.mxu0 %v1829_v25  ;;  %v2295_v41 = vld [vmem:[%s2455_s4] ss:$0 sm:$0xff] }
 0x168   : > { %v717_v45 = vmax.f32 %v629_v37, 0.0  ;;  %v743_v53 = vpack.c.bf16 %v719_v42, %v718_v46  ;;  %v733_v14 = vmax.f32 %v693_v10, 0.0  ;;  %v751_v23 = vpack.c.bf16 %v735_v22, %v734_v21 }
 0x16a   : > { %v742_v47 = vpack.c.bf16 %v717_v45, %v716_v44  ;;  %v750_v17 = vpack.c.bf16 %v733_v14, %v732_v61 }
 0x16c   : > { %1625 = vmatprep.mubr.bf16.mxu1 %v742_v47 }
 0x16d   : > { %1626 = vmatmul.mubr.bf16.gmra.mxu1 %v743_v53 }
 0x16e   : > { %1629 = vmatprep.mubr.bf16.mxu1 %v744_v48 }
 0x175   : > { %1630 = vmatmul.mubr.bf16.gmra.mxu1 %v745_v1 }
 0x176   : > { %1633 = vmatprep.mubr.bf16.mxu1 %v746_v63 }
 0x17d   : > { %1634 = vmatmul.mubr.bf16.gmra.mxu1 %v747_v11 }
 0x17e   : > { %1637 = vmatprep.mubr.bf16.mxu1 %v748_v8 }
 0x185   : > { %1638 = vmatmul.mubr.bf16.gmra.mxu1 %v749_v18 }
 0x186   : > { %1641 = vmatprep.mubr.bf16.mxu1 %v750_v17 }
 0x18d   : > { %1642 = vmatmul.mubr.bf16.gmra.mxu1 %v751_v23 }
 0x215   : > { %v1615_v26 = vpop.f32.mrf.mxu1 }
 0x216   : > { %v866_v31 = vadd.f32 %v1615_v26, %v2295_v41 }
 0x217   : > { %v857_v27 = vpop.f32.mrf.mxu1 }
 0x218   : > { %v858_v29 = vadd.f32 %v2295_v41, %v857_v27  ;;  %v986_v39 = vmax.f32 %v866_v31, 0.0 }
 0x219   : > { %v1616_v28 = vpop.f32.mrf.mxu1 }
 0x21a   : > { %v869_v30 = vadd.f32 %v1616_v28, %v2295_v41  ;;  %v984_v36 = vmax.f32 %v858_v29, 0.0 }
 0x21b   : > { %v860_v32 = vpop.f32.mrf.mxu1 }
 0x21c   : > { %v861_v33 = vadd.f32 %v2295_v41, %v860_v32  ;;  %v987_v34 = vmax.f32 %v869_v30, 0.0 }
 0x21d   : > { %v1619_v35 = vpop.f32.mrf.mxu1 }
 0x21e   : > { %v985_v37 = vmax.f32 %v861_v33, 0.0  ;;  %v1017_v44 = vpack.c.bf16 %v987_v34, %v986_v39  ;;  %v882_v48 = vadd.f32 %v1619_v35, %v2295_v41 }
 0x21f   : > { %v873_v42 = vpop.f32.mrf.mxu1 }
 0x220   : > { %v1016_v40 = vpack.c.bf16 %v985_v37, %v984_v36  ;;  %v874_v46 = vadd.f32 %v2295_v41, %v873_v42  ;;  %v990_v56 = vmax.f32 %v882_v48, 0.0 }
 0x221   : > { %v1620_v45 = vpop.f32.mrf.mxu1 }
 0x222   : > { %v885_v47 = vadd.f32 %v1620_v45, %v2295_v41  ;;  %1661 = vmatprep.mubr.bf16.mxu0 %v1016_v40  ;;  %v988_v54 = vmax.f32 %v874_v46, 0.0 }
 0x223   : > { %v876_v49 = vpop.f32.mrf.mxu1  ;;  %1662 = vmatmul.mubr.bf16.vlgmr.msra.gmra.mxu0 %v1017_v44 }
 0x224   : > { %v877_v50 = vadd.f32 %v2295_v41, %v876_v49  ;;  %v991_v51 = vmax.f32 %v885_v47, 0.0 }
 0x225   : > { %v1623_v53 = vpop.f32.mrf.mxu1 }
 0x226   : > { %v989_v55 = vmax.f32 %v877_v50, 0.0  ;;  %v1019_v60 = vpack.c.bf16 %v991_v51, %v990_v56  ;;  %v898_v0 = vadd.f32 %v1623_v53, %v2295_v41 }
 0x227   : > { %v889_v58 = vpop.f32.mrf.mxu1 }
 0x228   : > { %v1018_v59 = vpack.c.bf16 %v989_v55, %v988_v54  ;;  %v890_v63 = vadd.f32 %v2295_v41, %v889_v58  ;;  %v994_v5 = vmax.f32 %v898_v0, 0.0 }
 0x229   : > { %v1624_v62 = vpop.f32.mrf.mxu1 }
 0x22a   : > { %v901_v57 = vadd.f32 %v1624_v62, %v2295_v41  ;;  %1665 = vmatprep.mubr.bf16.mxu0 %v1018_v59  ;;  %v992_v3 = vmax.f32 %v890_v63, 0.0 }
 0x22b   : > { %v892_v1 = vpop.f32.mrf.mxu1  ;;  %1666 = vmatmul.mubr.bf16.gmra.mxu0 %v1019_v60 }
 0x22c   : > { %v893_v38 = vadd.f32 %v2295_v41, %v892_v1  ;;  %v995_v43 = vmax.f32 %v901_v57, 0.0 }
 0x22d   : > { %v1627_v2 = vpop.f32.mrf.mxu1 }
 0x22e   : > { %v993_v4 = vmax.f32 %v893_v38, 0.0  ;;  %v1021_v8 = vpack.c.bf16 %v995_v43, %v994_v5  ;;  %v914_v52 = vadd.f32 %v1627_v2, %v2295_v41 }
 0x22f   : > { %v905_v6 = vpop.f32.mrf.mxu1 }
 0x230   : > { %v1020_v7 = vpack.c.bf16 %v993_v4, %v992_v3  ;;  %v906_v10 = vadd.f32 %v2295_v41, %v905_v6  ;;  %v998_v18 = vmax.f32 %v914_v52, 0.0 }
 0x231   : > { %v1628_v9 = vpop.f32.mrf.mxu1 }
 0x232   : > { %v917_v11 = vadd.f32 %v1628_v9, %v2295_v41  ;;  %1669 = vmatprep.mubr.bf16.mxu0 %v1020_v7  ;;  %v996_v16 = vmax.f32 %v906_v10, 0.0 }
 0x233   : > { %v908_v12 = vpop.f32.mrf.mxu1  ;;  %1670 = vmatmul.mubr.bf16.gmra.mxu0 %v1021_v8 }
 0x234   : > { %v909_v61 = vadd.f32 %v2295_v41, %v908_v12  ;;  %v999_v14 = vmax.f32 %v917_v11, 0.0 }
 0x235   : > { %v1631_v15 = vpop.f32.mrf.mxu1 }
 0x236   : > { %v997_v17 = vmax.f32 %v909_v61, 0.0  ;;  %v1023_v21 = vpack.c.bf16 %v999_v14, %v998_v18  ;;  %v930_v24 = vadd.f32 %v1631_v15, %v2295_v41  ;;  %v2333_v61 = vld [vmem:[%s2457_s6] ss:$0 sm:$0xff] }
 0x237   : > { %v921_v19 = vpop.f32.mrf.mxu1 }
 0x238   : > { %v1022_v20 = vpack.c.bf16 %v997_v17, %v996_v16  ;;  %v922_v23 = vadd.f32 %v2295_v41, %v921_v19  ;;  %v1002_v31 = vmax.f32 %v930_v24, 0.0 }
 0x239   : > { %v1632_v22 = vpop.f32.mrf.mxu1 }
 0x23a   : > { %v933_v13 = vadd.f32 %v1632_v22, %v2295_v41  ;;  %1673 = vmatprep.mubr.bf16.mxu0 %v1022_v20  ;;  %v1000_v29 = vmax.f32 %v922_v23, 0.0 }
 0x23b   : > { %v924_v25 = vpop.f32.mrf.mxu1  ;;  %1674 = vmatmul.mubr.bf16.gmra.mxu0 %v1023_v21 }
 0x23c   : > { %v925_v26 = vadd.f32 %v2295_v41, %v924_v25  ;;  %v1003_v27 = vmax.f32 %v933_v13, 0.0 }
 0x23d   : > { %v1635_v28 = vpop.f32.mrf.mxu1 }
 0x23e   : > { %v1001_v30 = vmax.f32 %v925_v26, 0.0  ;;  %v1025_v34 = vpack.c.bf16 %v1003_v27, %v1002_v31  ;;  %v946_v39 = vadd.f32 %v1635_v28, %v2295_v41 }
 0x23f   : > { %v937_v32 = vpop.f32.mrf.mxu1 }
 0x240   : > { %v1024_v33 = vpack.c.bf16 %v1001_v30, %v1000_v29  ;;  %v938_v36 = vadd.f32 %v2295_v41, %v937_v32  ;;  %v1006_v48 = vmax.f32 %v946_v39, 0.0 }
 0x241   : > { %v1636_v35 = vpop.f32.mrf.mxu1 }
 0x242   : > { %v949_v37 = vadd.f32 %v1636_v35, %v2295_v41  ;;  %1677 = vmatprep.mubr.bf16.mxu0 %v1024_v33  ;;  %v1004_v46 = vmax.f32 %v938_v36, 0.0 }
 0x243   : > { %v940_v42 = vpop.f32.mrf.mxu1  ;;  %1678 = vmatmul.mubr.bf16.gmra.mxu0 %v1025_v34 }
 0x244   : > { %v941_v40 = vadd.f32 %v2295_v41, %v940_v42  ;;  %v1007_v44 = vmax.f32 %v949_v37, 0.0 }
 0x245   : > { %v1639_v45 = vpop.f32.mrf.mxu1 }
 0x246   : > { %v1005_v47 = vmax.f32 %v941_v40, 0.0  ;;  %v1027_v51 = vpack.c.bf16 %v1007_v44, %v1006_v48  ;;  %v962_v56 = vadd.f32 %v1639_v45, %v2295_v41 }
 0x247   : > { %v953_v49 = vpop.f32.mrf.mxu1 }
 0x248   : > { %v1026_v50 = vpack.c.bf16 %v1005_v47, %v1004_v46  ;;  %v954_v54 = vadd.f32 %v2295_v41, %v953_v49  ;;  %v1010_v0 = vmax.f32 %v962_v56, 0.0 }
 0x249   : > { %v1640_v53 = vpop.f32.mrf.mxu1 }
 0x24a   : > { %v965_v55 = vadd.f32 %v1640_v53, %v2295_v41  ;;  %1681 = vmatprep.mubr.bf16.mxu0 %v1026_v50  ;;  %v1008_v63 = vmax.f32 %v954_v54, 0.0 }
 0x24b   : > { %v956_v58 = vpop.f32.mrf.mxu1  ;;  %1682 = vmatmul.mubr.bf16.gmra.mxu0 %v1027_v51 }
 0x24c   : > { %v957_v59 = vadd.f32 %v2295_v41, %v956_v58  ;;  %v1011_v60 = vmax.f32 %v965_v55, 0.0 }
 0x24d   : > { %v1643_v62 = vpop.f32.mrf.mxu1 }
 0x24e   : > { %v1009_v57 = vmax.f32 %v957_v59, 0.0  ;;  %v1029_v43 = vpack.c.bf16 %v1011_v60, %v1010_v0  ;;  %v978_v5 = vadd.f32 %v1643_v62, %v2295_v41 }
 0x24f   : > { %v969_v1 = vpop.f32.mrf.mxu1 }
 0x250   : > { %v1028_v38 = vpack.c.bf16 %v1009_v57, %v1008_v63  ;;  %v970_v3 = vadd.f32 %v2295_v41, %v969_v1  ;;  %v1014_v11 = vmax.f32 %v978_v5, 0.0 }
 0x251   : > { %v1644_v2 = vpop.f32.mrf.mxu1 }
 0x252   : > { %v981_v4 = vadd.f32 %v1644_v2, %v2295_v41  ;;  %1685 = vmatprep.mubr.bf16.mxu0 %v1028_v38  ;;  %v1012_v9 = vmax.f32 %v970_v3, 0.0 }
 0x253   : > { %v972_v6 = vpop.f32.mrf.mxu1  ;;  %1686 = vmatmul.mubr.bf16.gmra.mxu0 %v1029_v43 }
 0x254   : > { %v973_v7 = vadd.f32 %v2295_v41, %v972_v6  ;;  %v1015_v8 = vmax.f32 %v981_v4, 0.0 }
 0x256   : > { %v1013_v10 = vmax.f32 %v973_v7, 0.0  ;;  %v1031_v12 = vpack.c.bf16 %v1015_v8, %v1014_v11 }
 0x258   : > { %v1030_v52 = vpack.c.bf16 %v1013_v10, %v1012_v9 }
 0x25a   : > { %1689 = vmatprep.mubr.bf16.mxu0 %v1030_v52 }
 0x25b   : > { %1690 = vmatmul.mubr.bf16.gmra.mxu0 %v1031_v12 }
 0x2e3   : > { %v1663_v14 = vpop.f32.mrf.mxu0 }
 0x2e4   : > { %v1146_v15 = vadd.f32 %v1663_v14, %v2333_v61 }
 0x2e5   : > { %v1137_v16 = vpop.f32.mrf.mxu0 }
 0x2e6   : > { %1266 = vst [vmem:[%s2336_s21 + $0x10] sm:$0xff] %v1146_v15  ;;  %v1138_v41 = vadd.f32 %v2333_v61, %v1137_v16 }
 0x2e7   : > { %v1664_v17 = vpop.f32.mrf.mxu0 }
 0x2e8   : > { %1264 = vst [vmem:[%s2336_s21] sm:$0xff] %v1138_v41  ;;  %v1149_v18 = vadd.f32 %v1664_v17, %v2333_v61 }
 0x2e9   : > { %v1140_v19 = vpop.f32.mrf.mxu0 }
 0x2ea   : > { %1267 = vst [vmem:[%s2336_s21 + $0x18] sm:$0xff] %v1149_v18  ;;  %v1141_v20 = vadd.f32 %v2333_v61, %v1140_v19 }
 0x2eb   : > { %v1667_v21 = vpop.f32.mrf.mxu0 }
 0x2ec   : > { %1265 = vst [vmem:[%s2336_s21 + $0x8] sm:$0xff] %v1141_v20  ;;  %v1162_v22 = vadd.f32 %v1667_v21, %v2333_v61 }
 0x2ed   : > { %v1153_v23 = vpop.f32.mrf.mxu0 }
 0x2ee   : > { %1270 = vst [vmem:[%s2336_s21 + $0x30] sm:$0xff] %v1162_v22  ;;  %v1154_v13 = vadd.f32 %v2333_v61, %v1153_v23 }
 0x2ef   : > { %v1668_v24 = vpop.f32.mrf.mxu0 }
 0x2f0   : > { %1268 = vst [vmem:[%s2336_s21 + $0x20] sm:$0xff] %v1154_v13  ;;  %v1165_v25 = vadd.f32 %v1668_v24, %v2333_v61 }
 0x2f1   : > { %v1156_v26 = vpop.f32.mrf.mxu0 }
 0x2f2   : > { %1271 = vst [vmem:[%s2336_s21 + $0x38] sm:$0xff] %v1165_v25  ;;  %v1157_v27 = vadd.f32 %v2333_v61, %v1156_v26 }
 0x2f3   : > { %v1671_v28 = vpop.f32.mrf.mxu0 }
 0x2f4   : > { %1269 = vst [vmem:[%s2336_s21 + $0x28] sm:$0xff] %v1157_v27  ;;  %v1178_v29 = vadd.f32 %v1671_v28, %v2333_v61 }
 0x2f5   : > { %v1169_v30 = vpop.f32.mrf.mxu0 }
 0x2f6   : > { %1274 = vst [vmem:[%s2336_s21 + $0x50] sm:$0xff] %v1178_v29  ;;  %v1170_v31 = vadd.f32 %v2333_v61, %v1169_v30 }
 0x2f7   : > { %v1672_v32 = vpop.f32.mrf.mxu0 }
 0x2f8   : > { %1272 = vst [vmem:[%s2336_s21 + $0x40] sm:$0xff] %v1170_v31  ;;  %v1181_v33 = vadd.f32 %v1672_v32, %v2333_v61 }
 0x2f9   : > { %v1172_v34 = vpop.f32.mrf.mxu0 }
 0x2fa   : > { %1275 = vst [vmem:[%s2336_s21 + $0x58] sm:$0xff] %v1181_v33  ;;  %v1173_v35 = vadd.f32 %v2333_v61, %v1172_v34 }
 0x2fb   : > { %v1675_v36 = vpop.f32.mrf.mxu0 }
 0x2fc   : > { %1273 = vst [vmem:[%s2336_s21 + $0x48] sm:$0xff] %v1173_v35  ;;  %v1194_v37 = vadd.f32 %v1675_v36, %v2333_v61 }
 0x2fd   : > { %v1185_v39 = vpop.f32.mrf.mxu0 }
 0x2fe   : > { %1278 = vst [vmem:[%s2336_s21 + $0x70] sm:$0xff] %v1194_v37  ;;  %v1186_v42 = vadd.f32 %v2333_v61, %v1185_v39 }
 0x2ff   : > { %v1676_v40 = vpop.f32.mrf.mxu0 }
 0x300   : > { %1276 = vst [vmem:[%s2336_s21 + $0x60] sm:$0xff] %v1186_v42  ;;  %v1197_v44 = vadd.f32 %v1676_v40, %v2333_v61 }
 0x301   : > { %v1188_v45 = vpop.f32.mrf.mxu0 }
 0x302   : > { %1279 = vst [vmem:[%s2336_s21 + $0x78] sm:$0xff] %v1197_v44  ;;  %v1189_v46 = vadd.f32 %v2333_v61, %v1188_v45 }
 0x303   : > { %v1679_v47 = vpop.f32.mrf.mxu0 }
 0x304   : > { %1277 = vst [vmem:[%s2336_s21 + $0x68] sm:$0xff] %v1189_v46  ;;  %v1210_v48 = vadd.f32 %v1679_v47, %v2333_v61 }
 0x305   : > { %v1201_v49 = vpop.f32.mrf.mxu0 }
 0x306   : > { %1282 = vst [vmem:[%s2336_s21 + $0x90] sm:$0xff] %v1210_v48  ;;  %v1202_v50 = vadd.f32 %v2333_v61, %v1201_v49 }
 0x307   : > { %v1680_v51 = vpop.f32.mrf.mxu0 }
 0x308   : > { %1280 = vst [vmem:[%s2336_s21 + $0x80] sm:$0xff] %v1202_v50  ;;  %v1213_v53 = vadd.f32 %v1680_v51, %v2333_v61 }
 0x309   : > { %v1204_v54 = vpop.f32.mrf.mxu0 }
 0x30a   : > { %1283 = vst [vmem:[%s2336_s21 + $0x98] sm:$0xff] %v1213_v53  ;;  %v1205_v55 = vadd.f32 %v2333_v61, %v1204_v54 }
 0x30b   : > { %v1683_v56 = vpop.f32.mrf.mxu0 }
 0x30c   : > { %1281 = vst [vmem:[%s2336_s21 + $0x88] sm:$0xff] %v1205_v55  ;;  %v1226_v58 = vadd.f32 %v1683_v56, %v2333_v61 }
 0x30d   : > { %v1217_v59 = vpop.f32.mrf.mxu0 }
 0x30e   : > { %1286 = vst [vmem:[%s2336_s21 + $0xb0] sm:$0xff] %v1226_v58  ;;  %v1218_v60 = vadd.f32 %v2333_v61, %v1217_v59 }
 0x30f   : > { %v1684_v62 = vpop.f32.mrf.mxu0 }
 0x310   : > { %1284 = vst [vmem:[%s2336_s21 + $0xa0] sm:$0xff] %v1218_v60  ;;  %v1229_v63 = vadd.f32 %v1684_v62, %v2333_v61 }
 0x311   : > { %v1220_v57 = vpop.f32.mrf.mxu0 }
 0x312   : > { %1287 = vst [vmem:[%s2336_s21 + $0xb8] sm:$0xff] %v1229_v63  ;;  %v1221_v0 = vadd.f32 %v2333_v61, %v1220_v57 }
 0x313   : > { %v1687_v1 = vpop.f32.mrf.mxu0 }
 0x314   : > { %1285 = vst [vmem:[%s2336_s21 + $0xa8] sm:$0xff] %v1221_v0  ;;  %v1242_v38 = vadd.f32 %v1687_v1, %v2333_v61 }
 0x315   : > { %v1233_v43 = vpop.f32.mrf.mxu0 }
 0x316   : > { %1290 = vst [vmem:[%s2336_s21 + $0xd0] sm:$0xff] %v1242_v38  ;;  %v1234_v2 = vadd.f32 %v2333_v61, %v1233_v43 }
 0x317   : > { %v1688_v3 = vpop.f32.mrf.mxu0 }
 0x318   : > { %1288 = vst [vmem:[%s2336_s21 + $0xc0] sm:$0xff] %v1234_v2  ;;  %v1245_v4 = vadd.f32 %v1688_v3, %v2333_v61 }
 0x319   : > { %v1236_v5 = vpop.f32.mrf.mxu0 }
 0x31a   : > { %1291 = vst [vmem:[%s2336_s21 + $0xd8] sm:$0xff] %v1245_v4  ;;  %v1237_v6 = vadd.f32 %v2333_v61, %v1236_v5 }
 0x31b   : > { %v1691_v7 = vpop.f32.mrf.mxu0 }
 0x31c   : > { %1289 = vst [vmem:[%s2336_s21 + $0xc8] sm:$0xff] %v1237_v6  ;;  %v1258_v8 = vadd.f32 %v1691_v7, %v2333_v61 }
 0x31d   : > { %v1249_v9 = vpop.f32.mrf.mxu0 }
 0x31e   : > { %1294 = vst [vmem:[%s2336_s21 + $0xf0] sm:$0xff] %v1258_v8  ;;  %v1250_v10 = vadd.f32 %v2333_v61, %v1249_v9 }
 0x31f   : > { %v1692_v11 = vpop.f32.mrf.mxu0 }
 0x320   : > { %1292 = vst [vmem:[%s2336_s21 + $0xe0] sm:$0xff] %v1250_v10  ;;  %v1261_v52 = vadd.f32 %v1692_v11, %v2333_v61 }
 0x321   : > { %v1252_v12 = vpop.f32.mrf.mxu0 }
 0x322   : > { %1295 = vst [vmem:[%s2336_s21 + $0xf8] sm:$0xff] %v1261_v52  ;;  %v1253_v14 = vadd.f32 %v2333_v61, %v1252_v12 }
 0x324   : > { %1293 = vst [vmem:[%s2336_s21 + $0xe8] sm:$0xff] %v1253_v14 }
 0x325   : > { %1949 = shalt.err (!%p1946_p10)
}
 0x326   : > { %s1950_s13 = scalar_lea.hbm %s2403_s16, 4096  ;;  %s1954_s11 = scalar_lea.hbm %s2458_s7, 8192 }
 0x327   : > { %p1951_p6 = scmp.ne.s32.totalorder %s2403_s16, %s1950_s13  ;;  %p1955_p3 = scmp.lt.s32.totalorder %s2403_s16, %s2458_s7 }
 0x328   : > { %p1956_p11 = scmp.lt.s32.totalorder %s1954_s11, %s1950_s13 }
 0x329   : > { %p1952_p4 = pnand %p1951_p6, %p2481_p1 }
 0x32a   : > { %p1957_p5 = por %p1956_p11, %p1955_p3 }
 0x32b   : > { %p1953_p8 = pneg %p1952_p4 }
 0x32d   : > { %p1958_p7 = pnand %p1957_p5, %p1953_p8 }
 0x32f   : > { %1961 = shalt.err (!%p1958_p7)
}
 0x330   : > { %s2017_s23 = smov 128   ;;  %s2018_s1 = smov 8  }
 0x331   : > { %1723 = dma.vmem_to_hbm [thread:$0]  (%p2481_p1), %s2405_s18, 4096, %s2403_s16, %s1297_s28, %s2017_s23, %s2017_s23, %s2018_s1  }
 0x332 PF: > { %s1325_s29 = sand.u32 1, %s1996_s24   ;;  %p2482_p12 = scmp.ne.s32.totalorder %s2467_s8, 0 }
 0x333   : > { %p2483_p9 = scmp.ge.s32.totalorder %s2008_s27, 2  ;;  %s1326_s30 = scalar_lea.sflag [#allocation4], %s1325_s29 }
 0x335   : > { %p1740_p13 = pnand %p2483_p9, %p2482_p12 }
 0x337   : > { %p1741_p0 = pneg %p1740_p13 }
 0x339   : > { %1991 = dma.done.wait (%p1741_p0), %s1326_s30, 4096  }
 0x33a   : > { %1993 = vsyncadd (%p1741_p0), %s1326_s30, 4294963200  ;;  %p22_p2 = scmp.ge.s32.totalorder %s2148_s14, 4   ;;  %s2484_s24 = smov %s2000_s25 }
 0x33b   : > { %s2485_s25 = smov %s2004_s26  ;;  %s2486_s26 = smov %s2158_s17 }
 0x33c   : > { %s2487_s27 = smov %s2148_s14  ;;  %24 = sbr.rel (!%p22_p2) target bundleno = 9 (0x9), region = 105 }
 0x341   :  { %1331 = vsyncpa [#allocation3], 1 }
 0x342   :  { %1333 = vsyncpa [#allocation3 + $0x1], 1 }
 0x343   :  { %1334 = vsyncpa [#allocation6], 1 }
 0x344   :  { %1335 = vsyncpa [#allocation9], 1 }
 0x345   :  { %1336 = vsyncpa [#allocation4], 1 }
 0x346   :  { %1338 = vsyncpa [#allocation4 + $0x1], 1 }

</bundles_post_ra>
